<compile_context>
chip_gen: v7x
topology: tpu7x:2x2x1
jax: 0.10.0
libtpu: 0.0.40
codegen_flags: <defaults>
</compile_context>

<pallas_src>
import functools

import jax
import jax.numpy as jnp
from jax.experimental import pallas as pl
from jax.experimental.pallas import tpu as pltpu

LOGSTD_MIN = -5.0
LOGSTD_MAX = 2.0


def _actor_kernel(x_ref, w1_ref, b1_ref, w2_ref, b2_ref, whl_ref, bhl_ref,
                  out_ref, *, act_dim, half_range, offset):
    # Feature net: two Linear + ReLU layers. bf16 operands, f32 accumulation,
    # f32 elementwise (ReLU), re-cast to bf16 only as the next matmul operand.
    h1 = jnp.dot(x_ref[...], w1_ref[...],
                 preferred_element_type=jnp.float32) + b1_ref[...]
    h1 = jnp.maximum(h1, 0.0).astype(jnp.bfloat16)

    h2 = jnp.dot(h1, w2_ref[...],
                 preferred_element_type=jnp.float32) + b2_ref[...]
    h2 = jnp.maximum(h2, 0.0).astype(jnp.bfloat16)

    # Fused heads: columns [0, act_dim) = mean, [act_dim, 2*act_dim) = log_std
    # (pre-squash), rest = zero padding.
    heads = jnp.dot(h2, whl_ref[...],
                    preferred_element_type=jnp.float32) + bhl_ref[...]

    # tanh squash + folded rescale (single FMA) applied to the logstd lanes;
    # mean lanes pass through untouched (lane select on the VPU).
    squashed = jnp.tanh(heads) * half_range + offset
    col = jax.lax.broadcasted_iota(jnp.int32, heads.shape, 1)
    out_ref[...] = jnp.where(col >= act_dim, squashed, heads)


def actor_forward(x, params, *, logstd_min=LOGSTD_MIN, logstd_max=LOGSTD_MAX):
    """x: [B, obs_dim] f32.

    params: dict with transposed weights w1/w2/wh/wl of shape [in, out] and
    biases b1/b2/bh/bl of shape [1, out]. Returns (mean, log_std), both f32
    [B, act_dim].
    """
    B, obs_dim = x.shape
    hid = params["w1"].shape[1]
    act_dim = params["wh"].shape[1]

    # Lane-dense padded dims (exact: zero rows/cols of a Linear contribute 0,
    # and ReLU(0) = 0).
    hid_pad = max(128, pl.cdiv(hid, 128) * 128)
    out_pad = max(128, pl.cdiv(2 * act_dim, 128) * 128)

    def pad2(a, rows, cols):
        return jnp.pad(a, ((0, rows - a.shape[0]), (0, cols - a.shape[1])))

    w1 = pad2(params["w1"], obs_dim, hid_pad).astype(jnp.bfloat16)
    b1 = pad2(params["b1"], 1, hid_pad).astype(jnp.float32)
    w2 = pad2(params["w2"], hid_pad, hid_pad).astype(jnp.bfloat16)
    b2 = pad2(params["b2"], 1, hid_pad).astype(jnp.float32)
    # Fuse the two heads into one matmul.
    whl = pad2(jnp.concatenate([params["wh"], params["wl"]], axis=1),
               hid_pad, out_pad).astype(jnp.bfloat16)
    bhl = pad2(jnp.concatenate([params["bh"], params["bl"]], axis=1),
               1, out_pad).astype(jnp.float32)

    # Batch tiling: one block if small, 256-row tiles (pipelined, parallel
    # across cores) otherwise. Tiny tiles -> well under VMEM on v7x (64 MiB).
    tm = B if B <= 256 else 256
    b_pad = pl.cdiv(B, tm) * tm
    x_in = x if b_pad == B else jnp.pad(x, ((0, b_pad - B), (0, 0)))
    x_in = x_in.astype(jnp.bfloat16)
    grid = (b_pad // tm,)

    half_range = 0.5 * (logstd_max - logstd_min)
    off = logstd_min + half_range

    kernel = functools.partial(_actor_kernel, act_dim=act_dim,
                               half_range=half_range, offset=off)

    resident = lambda i: (0, 0)            # weights/biases stay in VMEM
    batch_tile = lambda i: (i, 0)

    cost = pl.CostEstimate(
        flops=2 * b_pad * (obs_dim * hid_pad + hid_pad * hid_pad
                           + hid_pad * out_pad),
        transcendentals=b_pad * out_pad,
        bytes_accessed=(x_in.size * 2
                        + (w1.size + w2.size + whl.size) * 2
                        + (b1.size + b2.size + bhl.size) * 4
                        + b_pad * out_pad * 4),
    )

    fused = pl.pallas_call(
        kernel,
        out_shape=jax.ShapeDtypeStruct((b_pad, out_pad), jnp.float32),
        grid_spec=pltpu.PrefetchScalarGridSpec(
            num_scalar_prefetch=0,
            grid=grid,
            in_specs=[
                pl.BlockSpec((tm, obs_dim), batch_tile),        # x
                pl.BlockSpec((obs_dim, hid_pad), resident),     # w1
                pl.BlockSpec((1, hid_pad), resident),           # b1
                pl.BlockSpec((hid_pad, hid_pad), resident),     # w2
                pl.BlockSpec((1, hid_pad), resident),           # b2
                pl.BlockSpec((hid_pad, out_pad), resident),     # fused head W
                pl.BlockSpec((1, out_pad), resident),           # fused head b
            ],
            out_specs=pl.BlockSpec((tm, out_pad), batch_tile),
        ),
        compiler_params=pltpu.CompilerParams(
            dimension_semantics=("parallel",)),
        cost_estimate=cost,
    )(x_in, w1, b1, w2, b2, whl, bhl)

    mean = fused[:B, :act_dim]
    log_std = fused[:B, act_dim:2 * act_dim]
    return mean, log_std


def orthogonal_linear(key, in_dim, out_dim, gain=1.0):
    """PyTorch-style Linear: orthogonal weight init, zero bias.

    Returns (W_T, b): W_T is [in_dim, out_dim] (pre-transposed for x @ W_T),
    b is [1, out_dim].
    """
    w = jax.nn.initializers.orthogonal(scale=gain)(
        key, (out_dim, in_dim), jnp.float32)
    return w.T, jnp.zeros((1, out_dim), jnp.float32)


def reference_forward(x, p, *, bf16_operands):
    """Pure-JAX reference. If bf16_operands, mimic the kernel's operand
    rounding (bf16 inputs, f32 accumulate) to allow a tight tolerance."""
    def cast(a):
        return a.astype(jnp.bfloat16).astype(jnp.float32) if bf16_operands else a

    h1 = jnp.maximum(cast(x) @ cast(p["w1"]) + p["b1"], 0.0)
    h2 = jnp.maximum(cast(h1) @ cast(p["w2"]) + p["b2"], 0.0)
    mean = cast(h2) @ cast(p["wh"]) + p["bh"]
    ls = jnp.tanh(cast(h2) @ cast(p["wl"]) + p["bl"])
    ls = LOGSTD_MIN + 0.5 * (LOGSTD_MAX - LOGSTD_MIN) * (ls + 1.0)
    return mean, ls


if __name__ == "__main__":
    B, OBS, HID, ACT = 8, 32, 32, 8

    key = jax.random.PRNGKey(0)
    k_x, k1, k2, kh, kl = jax.random.split(key, 5)

    x = jax.random.normal(k_x, (B, OBS), jnp.float32)

    w1, b1 = orthogonal_linear(k1, OBS, HID)
    w2, b2 = orthogonal_linear(k2, HID, HID)
    wh, bh = orthogonal_linear(kh, HID, ACT)
    wl, bl = orthogonal_linear(kl, HID, ACT)
    params = dict(w1=w1, b1=b1, w2=w2, b2=b2, wh=wh, bh=bh, wl=wl, bl=bl)

    mean, log_std = actor_forward(x, params)
    jax.block_until_ready((mean, log_std))

    assert mean.shape == (B, ACT) and log_std.shape == (B, ACT)

    # Tight check against a reference that matches the kernel's bf16-operand /
    # f32-accumulate precision choice.
    m_bf, ls_bf = reference_forward(x, params, bf16_operands=True)
    assert jnp.allclose(mean, m_bf, atol=2e-3, rtol=2e-3)
    assert jnp.allclose(log_std, ls_bf, atol=2e-3, rtol=2e-3)

    # Loose sanity check against the full-f32 reference (documents the
    # deliberate bf16 matmul-operand precision trade-off).
    m_f32, ls_f32 = reference_forward(x, params, bf16_operands=False)
    assert jnp.allclose(mean, m_f32, atol=5e-2, rtol=5e-2)
    assert jnp.allclose(log_std, ls_f32, atol=5e-2, rtol=5e-2)

    print("KERNEL_OK")
</pallas_src>

<mosaic_0001>
module attributes {stable_mosaic.version = 11 : i64} {
  func.func @_actor_kernel(%arg0: i32, %arg1: memref<8x32xbf16, #tpu.memory_space<vmem>>, %arg2: memref<32x128xbf16, #tpu.memory_space<vmem>>, %arg3: memref<1x128xf32, #tpu.memory_space<vmem>>, %arg4: memref<128x128xbf16, #tpu.memory_space<vmem>>, %arg5: memref<1x128xf32, #tpu.memory_space<vmem>>, %arg6: memref<128x128xbf16, #tpu.memory_space<vmem>>, %arg7: memref<1x128xf32, #tpu.memory_space<vmem>>, %arg8: memref<8x128xf32, #tpu.memory_space<vmem>>) attributes {dimension_semantics = [#tpu.dimension_semantics<parallel>], iteration_bounds = array<i64: 1>, scalar_prefetch = 0 : i64, scratch_operands = 0 : i64, tpu.core_type = #tpu.core_type<tc>, window_params = [{transform_indices = @transform_0, window_bounds = array<i64: 8, 32>}, {pipeline_mode = #tpu.pipeline_mode<synchronous>, transform_indices = @transform_1, window_bounds = array<i64: 32, 128>}, {pipeline_mode = #tpu.pipeline_mode<synchronous>, transform_indices = @transform_2, window_bounds = array<i64: 1, 128>}, {pipeline_mode = #tpu.pipeline_mode<synchronous>, transform_indices = @transform_3, window_bounds = array<i64: 128, 128>}, {pipeline_mode = #tpu.pipeline_mode<synchronous>, transform_indices = @transform_4, window_bounds = array<i64: 1, 128>}, {pipeline_mode = #tpu.pipeline_mode<synchronous>, transform_indices = @transform_5, window_bounds = array<i64: 128, 128>}, {pipeline_mode = #tpu.pipeline_mode<synchronous>, transform_indices = @transform_6, window_bounds = array<i64: 1, 128>}, {transform_indices = @transform_7, window_bounds = array<i64: 8, 128>}]} {
    %c0 = arith.constant 0 : index
    %c0_0 = arith.constant 0 : index
    %0 = vector.load %arg1[%c0, %c0_0] : memref<8x32xbf16, #tpu.memory_space<vmem>>, vector<8x32xbf16>
    %c0_1 = arith.constant 0 : index
    %c0_2 = arith.constant 0 : index
    %1 = vector.load %arg2[%c0_1, %c0_2] : memref<32x128xbf16, #tpu.memory_space<vmem>>, vector<32x128xbf16>
    %cst = arith.constant dense<0.000000e+00> : vector<8x128xf32>
    %2 = tpu.matmul %0, %1, %cst {dimension_numbers = #tpu.dot_dimension_numbers<[1], [0], [0], [1], [0, 0, 1, 1], [], []>} : vector<8x32xbf16>, vector<32x128xbf16>, vector<8x128xf32> -> vector<8x128xf32>
    %c0_3 = arith.constant 0 : index
    %c0_4 = arith.constant 0 : index
    %3 = vector.load %arg3[%c0_3, %c0_4] : memref<1x128xf32, #tpu.memory_space<vmem>>, vector<1x128xf32>
    %4 = vector.broadcast %3 : vector<1x128xf32> to vector<8x128xf32>
    %5 = arith.addf %2, %4 : vector<8x128xf32>
    %cst_5 = arith.constant 0.000000e+00 : f32
    %6 = vector.broadcast %cst_5 : f32 to vector<8x128xf32>
    %7 = arith.maximumf %5, %6 : vector<8x128xf32>
    %8 = arith.truncf %7 : vector<8x128xf32> to vector<8x128xbf16>
    %c0_6 = arith.constant 0 : index
    %c0_7 = arith.constant 0 : index
    %9 = vector.load %arg4[%c0_6, %c0_7] : memref<128x128xbf16, #tpu.memory_space<vmem>>, vector<128x128xbf16>
    %cst_8 = arith.constant dense<0.000000e+00> : vector<8x128xf32>
    %10 = tpu.matmul %8, %9, %cst_8 {dimension_numbers = #tpu.dot_dimension_numbers<[1], [0], [0], [1], [0, 0, 1, 1], [], []>} : vector<8x128xbf16>, vector<128x128xbf16>, vector<8x128xf32> -> vector<8x128xf32>
    %c0_9 = arith.constant 0 : index
    %c0_10 = arith.constant 0 : index
    %11 = vector.load %arg5[%c0_9, %c0_10] : memref<1x128xf32, #tpu.memory_space<vmem>>, vector<1x128xf32>
    %12 = vector.broadcast %11 : vector<1x128xf32> to vector<8x128xf32>
    %13 = arith.addf %10, %12 : vector<8x128xf32>
    %cst_11 = arith.constant 0.000000e+00 : f32
    %14 = vector.broadcast %cst_11 : f32 to vector<8x128xf32>
    %15 = arith.maximumf %13, %14 : vector<8x128xf32>
    %16 = arith.truncf %15 : vector<8x128xf32> to vector<8x128xbf16>
    %c0_12 = arith.constant 0 : index
    %c0_13 = arith.constant 0 : index
    %17 = vector.load %arg6[%c0_12, %c0_13] : memref<128x128xbf16, #tpu.memory_space<vmem>>, vector<128x128xbf16>
    %cst_14 = arith.constant dense<0.000000e+00> : vector<8x128xf32>
    %18 = tpu.matmul %16, %17, %cst_14 {dimension_numbers = #tpu.dot_dimension_numbers<[1], [0], [0], [1], [0, 0, 1, 1], [], []>} : vector<8x128xbf16>, vector<128x128xbf16>, vector<8x128xf32> -> vector<8x128xf32>
    %c0_15 = arith.constant 0 : index
    %c0_16 = arith.constant 0 : index
    %19 = vector.load %arg7[%c0_15, %c0_16] : memref<1x128xf32, #tpu.memory_space<vmem>>, vector<1x128xf32>
    %20 = vector.broadcast %19 : vector<1x128xf32> to vector<8x128xf32>
    %21 = arith.addf %18, %20 : vector<8x128xf32>
    %22 = math.tanh %21 : vector<8x128xf32>
    %cst_17 = arith.constant 3.500000e+00 : f32
    %23 = vector.broadcast %cst_17 : f32 to vector<8x128xf32>
    %24 = arith.mulf %22, %23 : vector<8x128xf32>
    %cst_18 = arith.constant -1.500000e+00 : f32
    %25 = vector.broadcast %cst_18 : f32 to vector<8x128xf32>
    %26 = arith.addf %24, %25 : vector<8x128xf32>
    %27 = tpu.iota {dimensions = array<i32: 1>} : vector<8x128xi32>
    %c8_i32 = arith.constant 8 : i32
    %28 = vector.broadcast %c8_i32 : i32 to vector<8x128xi32>
    %29 = arith.cmpi sge, %27, %28 : vector<8x128xi32>
    %30 = arith.select %29, %26, %21 : vector<8x128xi1>, vector<8x128xf32>
    %c0_19 = arith.constant 0 : index
    %c0_20 = arith.constant 0 : index
    %31 = vector.load %arg8[%c0_19, %c0_20] : memref<8x128xf32, #tpu.memory_space<vmem>>, vector<8x128xf32>
    tpu.vector_store %arg8[%c0_19, %c0_20], %30 {strides = array<i32>} : memref<8x128xf32, #tpu.memory_space<vmem>>, vector<8x128xf32>,
    return
  }
  func.func @transform_0(%arg0: i32) -> (i32, i32) {
    %c0_i32 = arith.constant 0 : i32
    %c0_i32_0 = arith.constant 0 : i32
    return %arg0, %c0_i32 : i32, i32
  }
  func.func @transform_1(%arg0: i32) -> (i32, i32) {
    %c0_i32 = arith.constant 0 : i32
    %c0_i32_0 = arith.constant 0 : i32
    %c0_i32_1 = arith.constant 0 : i32
    return %c0_i32, %c0_i32_0 : i32, i32
  }
  func.func @transform_2(%arg0: i32) -> (i32, i32) {
    %c0_i32 = arith.constant 0 : i32
    %c0_i32_0 = arith.constant 0 : i32
    %c0_i32_1 = arith.constant 0 : i32
    return %c0_i32, %c0_i32_0 : i32, i32
  }
  func.func @transform_3(%arg0: i32) -> (i32, i32) {
    %c0_i32 = arith.constant 0 : i32
    %c0_i32_0 = arith.constant 0 : i32
    %c0_i32_1 = arith.constant 0 : i32
    return %c0_i32, %c0_i32_0 : i32, i32
  }
  func.func @transform_4(%arg0: i32) -> (i32, i32) {
    %c0_i32 = arith.constant 0 : i32
    %c0_i32_0 = arith.constant 0 : i32
    %c0_i32_1 = arith.constant 0 : i32
    return %c0_i32, %c0_i32_0 : i32, i32
  }
  func.func @transform_5(%arg0: i32) -> (i32, i32) {
    %c0_i32 = arith.constant 0 : i32
    %c0_i32_0 = arith.constant 0 : i32
    %c0_i32_1 = arith.constant 0 : i32
    return %c0_i32, %c0_i32_0 : i32, i32
  }
  func.func @transform_6(%arg0: i32) -> (i32, i32) {
    %c0_i32 = arith.constant 0 : i32
    %c0_i32_0 = arith.constant 0 : i32
    %c0_i32_1 = arith.constant 0 : i32
    return %c0_i32, %c0_i32_0 : i32, i32
  }
  func.func @transform_7(%arg0: i32) -> (i32, i32) {
    %c0_i32 = arith.constant 0 : i32
    %c0_i32_0 = arith.constant 0 : i32
    return %arg0, %c0_i32 : i32, i32
  }
}

</mosaic_0001>

<bundles_post_ra>
// kernel: tpu_custom_call.1
= control target key start
LH: loop header
LB: loop body
LE: loop exit
PB: predicated region body
PF: predicated region fallthrough
CT: control target
= control target key end

     0   :  { %12 = vsyncpa [#allocation3], 0  ;;  %s789_s0 = inlined_call_operand.hbm [shape: bf16[8,32], index: 0, kind: input, shape index: {}]   ;;  %s790_s1 = inlined_call_operand.hbm [shape: bf16[32,128], index: 1, kind: input, shape index: {}]   ;;  %s791_s2 = inlined_call_operand.vmem [shape: f32[1,128], index: 2, kind: input, shape index: {}]   ;;  %s792_s3 = inlined_call_operand.hbm [shape: bf16[128,128], index: 3, kind: input, shape index: {}]   ;;  %s793_s4 = inlined_call_operand.vmem [shape: f32[1,128], index: 4, kind: input, shape index: {}]   ;;  %s794_s5 = inlined_call_operand.hbm [shape: bf16[128,128], index: 5, kind: input, shape index: {}]   ;;  %s795_s6 = inlined_call_operand.vmem [shape: f32[1,128], index: 6, kind: input, shape index: {}]   ;;  %s796_s7 = inlined_call_operand.hbm [shape: f32[8,128], index: 7, kind: output, shape index: {}]  }
   0x1   :  { %13 = vsyncpa [#allocation6], 0 }
   0x2   :  { %14 = vsyncpa [#allocation9], 0 }
   0x3   :  { %15 = vsyncpa [#allocation4], 0  ;;  %s638_s24 = smov [#allocation5]   ;;  %s520_s28 = scalar_lea.hbm %s790_s1, 256 }
   0x4   :  { %s31_s25 = sshll.u32 %s638_s24, 4  ;;  %p521_p0 = scmp.ne.s32.totalorder %s790_s1, %s520_s28  ;;  %s32_s25 = int_to_ptr.vmem [resolvable:$true] %s31_s25 }
   0x5   :  { %p524_p1 = scmp.lt.u32.totalorder %s520_s28, %s790_s1 }
   0x7   :  { %p526_p2 = pnand %p524_p1, %p521_p0 }
   0x9   :  { %529 = shalt.err (!%p526_p2)
}
   0xa   :  { %s530_s10 = scalar_lea.vmem %s32_s25, 256  ;;  %p535_p4 = scmp.lt.s32.totalorder %s32_s25, %s32_s25 }
   0xb   :  { %p531_p3 = scmp.ne.s32.totalorder %s32_s25, %s530_s10  ;;  %p536_p5 = scmp.lt.s32.totalorder %s530_s10, %s530_s10 }
   0xd   :  { %p537_p6 = por %p536_p5, %p535_p4 }
   0xf   :  { %p538_p7 = pnand %p537_p6, %p531_p3 }
  0x11   :  { %541 = shalt.err (!%p538_p7)
}
  0x12   :  { %s639_s11 = smov 64   ;;  %s640_s12 = smov 4  }
  0x13   :  { %37 = dma.hbm_to_vmem [thread:$0]  %s790_s1, 256, %s32_s25, [#allocation6], %s639_s11, %s639_s11, %s640_s12  }
  0x14   :  { %s641_s15 = smov [#allocation2]   ;;  %s642_s17 = smov [#allocation7]  }
  0x15   :  { %s22_s16 = sshll.u32 %s641_s15, 4  ;;  %s45_s18 = sshll.u32 %s642_s17, 4  ;;  %s23_s16 = int_to_ptr.vmem [resolvable:$true] %s22_s16  ;;  %s46_s18 = int_to_ptr.vmem [resolvable:$true] %s45_s18 }
  0x16   :  { %s542_s21 = scalar_lea.hbm %s789_s0, 64 }
  0x17   :  { %p543_p8 = scmp.ne.s32.totalorder %s789_s0, %s542_s21  ;;  %p546_p9 = scmp.lt.u32.totalorder %s542_s21, %s789_s0 }
  0x19   :  { %p548_p10 = pnand %p546_p9, %p543_p8 }
  0x1b   :  { %551 = shalt.err (!%p548_p10)
}
  0x1c   :  { %s552_s1 = scalar_lea.vmem %s23_s16, 64  ;;  %p557_p12 = scmp.lt.s32.totalorder %s23_s16, %s23_s16 }
  0x1d   :  { %p553_p11 = scmp.ne.s32.totalorder %s23_s16, %s552_s1  ;;  %p558_p13 = scmp.lt.s32.totalorder %s552_s1, %s552_s1 }
  0x1f   :  { %p559_p0 = por %p558_p13, %p557_p12 }
  0x21   :  { %p560_p1 = pnand %p559_p0, %p553_p11 }
  0x23   :  { %563 = shalt.err (!%p560_p1)
}
  0x24   :  { %25 = dma.hbm_to_vmem [thread:$0]  %s789_s0, 64, %s23_s16, [#allocation3]  }
  0x25   :  { %s564_s30 = scalar_lea.hbm %s792_s3, 1024 }
  0x26   :  { %p565_p2 = scmp.ne.s32.totalorder %s792_s3, %s564_s30  ;;  %p568_p3 = scmp.lt.u32.totalorder %s564_s30, %s792_s3 }
  0x28   :  { %p570_p4 = pnand %p568_p3, %p565_p2 }
  0x2a   :  { %573 = shalt.err (!%p570_p4)
}
  0x2b   :  { %s574_s14 = scalar_lea.vmem %s46_s18, 1024  ;;  %p579_p6 = scmp.lt.s32.totalorder %s46_s18, %s46_s18 }
  0x2c   :  { %p575_p5 = scmp.ne.s32.totalorder %s46_s18, %s574_s14  ;;  %p580_p7 = scmp.lt.s32.totalorder %s574_s14, %s574_s14 }
  0x2e   :  { %p581_p8 = por %p580_p7, %p579_p6 }
  0x30   :  { %p582_p9 = pnand %p581_p8, %p575_p5 }
  0x32   :  { %585 = shalt.err (!%p582_p9)
}
  0x33   :  { %51 = dma.hbm_to_vmem [thread:$0]  %s792_s3, 1024, %s46_s18, [#allocation6], %s639_s11, %s639_s11, %s640_s12  }
  0x34   :  { %s643_s16 = smov [#allocation8]   ;;  %s586_s21 = scalar_lea.hbm %s794_s5, 1024 }
  0x35   :  { %s59_s17 = sshll.u32 %s643_s16, 4  ;;  %p587_p10 = scmp.ne.s32.totalorder %s794_s5, %s586_s21  ;;  %s60_s17 = int_to_ptr.vmem [resolvable:$true] %s59_s17 }
  0x36   :  { %p590_p11 = scmp.lt.u32.totalorder %s586_s21, %s794_s5 }
  0x38   :  { %p592_p12 = pnand %p590_p11, %p587_p10 }
  0x3a   :  { %595 = shalt.err (!%p592_p12)
}
  0x3b   :  { %s596_s1 = scalar_lea.vmem %s60_s17, 1024  ;;  %p601_p0 = scmp.lt.s32.totalorder %s60_s17, %s60_s17 }
  0x3c   :  { %p597_p13 = scmp.ne.s32.totalorder %s60_s17, %s596_s1  ;;  %p602_p1 = scmp.lt.s32.totalorder %s596_s1, %s596_s1 }
  0x3e   :  { %p603_p2 = por %p602_p1, %p601_p0 }
  0x40   :  { %p604_p3 = pnand %p603_p2, %p597_p13 }
  0x42   :  { %607 = shalt.err (!%p604_p3)
}
  0x43   :  { %65 = dma.hbm_to_vmem [thread:$0]  %s794_s5, 1024, %s60_s17, [#allocation9], %s639_s11, %s639_s11, %s640_s12  }
  0x44   :  { %630 = dma.done.wait [#allocation3], 64  }
  0x45   :  { %631 = vsyncadd [#allocation3], 4294967232 }
  0x46   :  { %632 = dma.done.wait [#allocation6], 1280  }
  0x47   :  { %633 = vsyncadd [#allocation6], 4294966016 }
  0x48   :  { %634 = dma.done.wait [#allocation9], 1024  }
  0x49   :  { %635 = vsyncadd [#allocation9], 4294966272  ;;  %v644_v0 = vmov 0.0   ;;  %vm645_vm0 = vmmov 0   ;;  %v500_v1 = vld [vmem:[#allocation5] sm:$0xff]   ;;  %v501_v2 = vld [vmem:[#allocation5 + $0x8] sm:$0xff]   ;;  %v378_v42 = vlaneseq }
  0x4a   :  { %443 = vmatprep.subr.bf16.mxu0 %v644_v0  ;;  %447 = vmatprep.mubr.msk.bf16.mxu0 %vm645_vm0, %v644_v0  ;;  %v502_v3 = vld [vmem:[#allocation7] sm:$0xff]   ;;  %vm105_vm1 = vcmask 261120   ;;  %v503_v4 = vld [vmem:[#allocation7 + $0x8] sm:$0xff]   ;;  %v504_v6 = vld [vmem:[#allocation7 + $0x10] sm:$0xff]  }
  0x4b   :  { %451 = vmatprep.subr.bf16.mxu1 %v644_v0  ;;  %467 = vmatprep.mubr.msk.bf16.mxu1 %vm645_vm0, %v644_v0  ;;  %v81_v5 = vld [vmem:[#allocation2] sm:$0xf]  ;;  %v505_v7 = vld [vmem:[#allocation7 + $0x18] sm:$0xff]   ;;  %v506_v8 = vld [vmem:[#allocation7 + $0x20] sm:$0xff]   ;;  %v379_v43 = vand.u32 127, %v378_v42 }
  0x4c   :  { %444 = vmatpush3.bf16.msra.mxu0 %v500_v1  ;;  %452 = vmatpush3.bf16.msra.mxu1 %v502_v3  ;;  %v507_v9 = vld [vmem:[#allocation7 + $0x28] sm:$0xff]   ;;  %v508_v10 = vld [vmem:[#allocation7 + $0x30] sm:$0xff]   ;;  %v509_v11 = vld [vmem:[#allocation7 + $0x38] sm:$0xff]  }
  0x4d   :  { %445 = vmatprep.subr.bf16.mxu0 %v644_v0  ;;  %453 = vmatprep.subr.bf16.mxu1 %v644_v0  ;;  %v510_v12 = vld [vmem:[#allocation8] sm:$0xff]   ;;  %v511_v13 = vld [vmem:[#allocation8 + $0x8] sm:$0xff]   ;;  %v512_v14 = vld [vmem:[#allocation8 + $0x10] sm:$0xff]   ;;  %vm380_vm2 = vcmp.ge.s32.totalorder %v379_v43, 8 }
  0x4e   :  { %v513_v15 = vld [vmem:[#allocation8 + $0x18] sm:$0xff]   ;;  %v514_v16 = vld [vmem:[#allocation8 + $0x20] sm:$0xff]   ;;  %v515_v17 = vld [vmem:[#allocation8 + $0x28] sm:$0xff]  }
  0x4f   :  { %v400_v18 = vld [vmem:[%s791_s2] ss:$0 sm:$0xff]  ;;  %v516_v26 = vld [vmem:[#allocation8 + $0x30] sm:$0xff]   ;;  %v517_v27 = vld [vmem:[#allocation8 + $0x38] sm:$0xff]  }
  0x50   :  { %446 = vmatpush3.bf16.msra.mxu0 %v501_v2  ;;  %454 = vmatpush3.bf16.msra.mxu1 %v503_v4  ;;  %v404_v28 = vld [vmem:[%s793_s4] ss:$0 sm:$0xff]  ;;  %s646_s4 = smov [#allocation10]  }
  0x51   :  { %471 = vmatprep.subr.bf16.mxu0 %v644_v0  ;;  %455 = vmatprep.subr.bf16.mxu1 %v644_v0  ;;  %v413_v36 = vld [vmem:[%s795_s6] ss:$0 sm:$0xff]  ;;  %s389_s28 = sshll.u32 %s646_s4, 4  ;;  %s390_s28 = int_to_ptr.vmem [resolvable:$true] %s389_s28 }
  0x52   :  { %s608_s29 = scalar_lea.vmem %s390_s28, 128  ;;  %p613_p5 = scmp.lt.s32.totalorder %s390_s28, %s390_s28 }
  0x53   :  { %448 = vmatmul.mubr.msk.bf16.vlgmr.msra.gmra.mrb[0].mxu0 %vm105_vm1, %v81_v5  ;;  %p609_p4 = scmp.ne.s32.totalorder %s390_s28, %s608_s29  ;;  %p614_p6 = scmp.lt.s32.totalorder %s608_s29, %s608_s29 }
  0x54   :  { %487 = vmatprep.mubr.msk.bf16.mxu0 %vm645_vm0, %v644_v0  ;;  %456 = vmatpush3.bf16.msra.mxu1 %v504_v6 }
  0x55   :  { %457 = vmatprep.subr.bf16.mxu1 %v644_v0  ;;  %472 = vmatpush3.bf16.msra.mxu0 %v510_v12  ;;  %p615_p7 = por %p614_p6, %p613_p5 }
  0x56   :  { %473 = vmatprep.subr.bf16.mxu0 %v644_v0 }
  0x57   :  { %p616_p8 = pnand %p615_p7, %p609_p4 }
  0x58   :  { %458 = vmatpush3.bf16.msra.mxu1 %v505_v7 }
  0x59   :  { %459 = vmatprep.subr.bf16.mxu1 %v644_v0  ;;  %474 = vmatpush3.bf16.msra.mxu0 %v511_v13 }
  0x5a   :  { %475 = vmatprep.subr.bf16.mxu0 %v644_v0 }
  0x5c   :  { %460 = vmatpush3.bf16.msra.mxu1 %v506_v8 }
  0x5d   :  { %461 = vmatprep.subr.bf16.mxu1 %v644_v0  ;;  %476 = vmatpush3.bf16.msra.mxu0 %v512_v14 }
  0x5e   :  { %477 = vmatprep.subr.bf16.mxu0 %v644_v0 }
  0x60   :  { %462 = vmatpush3.bf16.msra.mxu1 %v507_v9 }
  0x61   :  { %463 = vmatprep.subr.bf16.mxu1 %v644_v0  ;;  %478 = vmatpush3.bf16.msra.mxu0 %v513_v15 }
  0x62   :  { %479 = vmatprep.subr.bf16.mxu0 %v644_v0 }
  0x64   :  { %464 = vmatpush3.bf16.msra.mxu1 %v508_v10 }
  0x65   :  { %465 = vmatprep.subr.bf16.mxu1 %v644_v0  ;;  %480 = vmatpush3.bf16.msra.mxu0 %v514_v16 }
  0x66   :  { %481 = vmatprep.subr.bf16.mxu0 %v644_v0 }
  0x68   :  { %466 = vmatpush3.bf16.msra.mxu1 %v509_v11 }
  0x69   :  { %482 = vmatpush3.bf16.msra.mxu0 %v515_v17 }
  0x6a   :  { %483 = vmatprep.subr.bf16.mxu0 %v644_v0 }
  0x6d   :  { %484 = vmatpush3.bf16.msra.mxu0 %v516_v26 }
  0x6e   :  { %485 = vmatprep.subr.bf16.mxu0 %v644_v0 }
  0x71   :  { %486 = vmatpush3.bf16.msra.mxu0 %v517_v27 }
 0x126   :  { %v143_v19 = vpop.f32.mrb[0].mxu0 }
 0x127   :  { %v144_v20 = vadd.f32 %v400_v18, %v143_v19  ;;  %v449_v21 = vpop.f32.mrb[1].mxu0 }
 0x128   :  { %v146_v22 = vpop.f32.mrb[2].mxu0 }
 0x129   :  { %v149_v23 = vmax.f32 %v144_v20, 0.0  ;;  %v450_v24 = vpop.f32.mrb[3].mxu0 }
 0x12b   :  { %v150_v25 = vpack.c.bf16 %v149_v23, %v149_v23 }
 0x12d   :  { %468 = vmatmul.mubr.bf16.vlgmr.msra.gmra.mrb[0].mxu1 %v150_v25 }
 0x200   :  { %v256_v29 = vpop.f32.mrb[0].mxu1 }
 0x201   :  { %v257_v30 = vadd.f32 %v404_v28, %v256_v29  ;;  %v469_v31 = vpop.f32.mrb[1].mxu1 }
 0x202   :  { %v259_v32 = vpop.f32.mrb[2].mxu1 }
 0x203   :  { %v262_v33 = vmax.f32 %v257_v30, 0.0  ;;  %v470_v34 = vpop.f32.mrb[3].mxu1 }
 0x205   :  { %v263_v35 = vpack.c.bf16 %v262_v33, %v262_v33 }
 0x207   :  { %488 = vmatmul.mubr.bf16.vlgmr.msra.gmra.mrb[4].mxu0 %v263_v35 }
 0x2da   :  { %v369_v37 = vpop.f32.mrb[4].mxu0 }
 0x2db   :  { %v370_v38 = vadd.f32 %v413_v36, %v369_v37  ;;  %v489_v39 = vpop.f32.mrb[5].mxu0 }
 0x2dc   :  { %v372_v40 = vpop.f32.mrb[6].mxu0 }
 0x2dd   :  { %518 = vtanh.f32 %v370_v38  ;;  %v490_v41 = vpop.f32.mrb[7].mxu0 }
 0x2e7   :  { %v519_v44 = vpop.eup %518 }
 0x2e8   :  { %v376_v45 = vmul.f32 3.5, %v519_v44 }
 0x2ea   :  { %v377_v46 = vadd.f32 -1.5, %v376_v45 }
 0x2ec   :  { %v381_v47 = vsel %vm380_vm2, %v377_v46, %v370_v38 }
 0x2ed   :  { %382 = vst [vmem:[#allocation10] sm:$0xff] %v381_v47 }
 0x2ee   :  { %619 = shalt.err (!%p616_p8)
}
 0x2ef   :  { %s620_s8 = scalar_lea.hbm %s796_s7, 128 }
 0x2f0   :  { %p621_p9 = scmp.ne.s32.totalorder %s796_s7, %s620_s8  ;;  %p624_p10 = scmp.lt.u32.totalorder %s620_s8, %s796_s7 }
 0x2f2   :  { %p626_p11 = pnand %p624_p10, %p621_p9 }
 0x2f4   :  { %629 = shalt.err (!%p626_p11)
}
 0x2f5   :  { %392 = dma.vmem_to_hbm [thread:$0]  %s390_s28, 128, %s796_s7, [#allocation4]  }
 0x2f6   :  { %636 = dma.done.wait [#allocation4], 128  }
 0x2f7   :  { %637 = vsyncadd [#allocation4], 4294967168 }
 0x2f8   :  { %396 = vsyncpa [#allocation3], 1 }
 0x2f9   :  { %397 = vsyncpa [#allocation6], 1 }
 0x2fa   :  { %398 = vsyncpa [#allocation9], 1 }
 0x2fb   :  { %399 = vsyncpa [#allocation4], 1 }

</bundles_post_ra>
